<compile_context>
chip_gen: v6e
topology: v6e:2x2x1
jax: 0.10.0
libtpu: 0.0.40
codegen_flags: <defaults>
</compile_context>

<pallas_src>
import functools

import jax
import jax.numpy as jnp
from jax.experimental import pallas as pl
from jax.experimental.pallas import tpu as pltpu

LANE = 128      # vreg lane width  -> last-dim padding unit
SUBLANE = 8     # vreg sublane width -> batch-tile alignment unit


def _round_up(n, m):
    return ((n + m - 1) // m) * m


def _politique_kernel(x_ref, w1_ref, b1_ref, w2_ref, b2_ref, w3_ref, b3_ref,
                      out_ref, *, d_out_real):
    """One batch tile: full (padded) MLP + masked softmax, all in VMEM."""
    x = x_ref[...]

    # Hidden layer 1: Linear + ReLU (MXU matmul, f32 accumulation).
    h = jnp.dot(x, w1_ref[...], preferred_element_type=jnp.float32) + b1_ref[...]
    h = jnp.maximum(h, 0.0)

    # Hidden layer 2: Linear + ReLU.
    h = jnp.dot(h, w2_ref[...], preferred_element_type=jnp.float32) + b2_ref[...]
    h = jnp.maximum(h, 0.0)

    # Output layer: Linear.
    logits = jnp.dot(h, w3_ref[...], preferred_element_type=jnp.float32) + b3_ref[...]

    # Mask padded output columns to -inf so they contribute 0 to the softmax.
    col = jax.lax.broadcasted_iota(jnp.int32, logits.shape, 1)
    logits = jnp.where(col < d_out_real, logits, -jnp.inf)

    # Numerically-stable softmax along the feature axis (== torch dim=1).
    m = jnp.max(logits, axis=-1, keepdims=True)
    e = jnp.exp(logits - m)
    s = jnp.sum(e, axis=-1, keepdims=True)
    # Divide on the EUP slot (approx reciprocal); VPU only does the multiply.
    out_ref[...] = (e * pl.reciprocal(s, approx=True)).astype(out_ref.dtype)


def politique_forward(x, params, *, block_b=None):
    """x: (B, dim_entree) float32. params: dict of w1,b1,w2,b2,w3,b3."""
    B, d_in = x.shape
    w1, b1 = params["w1"], params["b1"]
    w2, b2 = params["w2"], params["b2"]
    w3, b3 = params["w3"], params["b3"]
    d_h1, d_h2, d_out = w1.shape[1], w2.shape[1], w3.shape[1]

    # ---- pad every feature dim up to a multiple of 128 (lane-dense tiles) ----
    dp_in = _round_up(d_in, LANE)
    dp_h1 = _round_up(d_h1, LANE)
    dp_h2 = _round_up(d_h2, LANE)
    dp_out = _round_up(d_out, LANE)

    def pad2(a, r, c):
        a = a.reshape((-1, a.shape[-1]))
        return jnp.pad(a, ((0, r - a.shape[0]), (0, c - a.shape[1])))

    w1p, b1p = pad2(w1, dp_in, dp_h1), pad2(b1, 1, dp_h1)
    w2p, b2p = pad2(w2, dp_h1, dp_h2), pad2(b2, 1, dp_h2)
    w3p, b3p = pad2(w3, dp_h2, dp_out), pad2(b3, 1, dp_out)

    # ---- pick a large, sublane-aligned batch tile; keep grid >= 2 when the
    # batch allows it so both v7x TensorCores get work on the parallel axis ----
    if block_b is None:
        bp = _round_up(B, SUBLANE)
        block_b = min(1024, bp)
        if bp > SUBLANE and pl.cdiv(bp, block_b) < 2:
            block_b = _round_up(pl.cdiv(bp, 2), SUBLANE)
    block_b = max(SUBLANE, _round_up(block_b, SUBLANE))

    Bp = _round_up(B, block_b)
    xp = jnp.pad(x.astype(jnp.float32), ((0, Bp - B), (0, dp_in - d_in)))

    grid = (Bp // block_b,)

    # ---- scoped-VMEM headroom estimate (only raise the limit when needed) ----
    f32 = 4
    est = f32 * (
        2 * block_b * dp_in                           # double-buffered x tile
        + 2 * block_b * dp_out                        # double-buffered out tile
        + 2 * (dp_in * dp_h1 + dp_h1 * dp_h2 + dp_h2 * dp_out
               + dp_h1 + dp_h2 + dp_out)              # resident params (2x buf)
        + 3 * block_b * max(dp_h1, dp_h2, dp_out))    # live activations
    vmem_limit = None
    if est > 12 * 1024 * 1024:
        vmem_limit = min(64 * 1024 * 1024, 2 * est)

    kernel = functools.partial(_politique_kernel, d_out_real=d_out)

    def param_spec(shape):
        # Parameter tensors: same full (already padded) block at every step.
        return pl.BlockSpec(shape, lambda i: (0, 0))

    out_p = pl.pallas_call(
        kernel,
        out_shape=jax.ShapeDtypeStruct((Bp, dp_out), jnp.float32),
        grid_spec=pltpu.PrefetchScalarGridSpec(
            num_scalar_prefetch=0,
            grid=grid,
            in_specs=[
                pl.BlockSpec((block_b, dp_in), lambda i: (i, 0)),   # x tile
                param_spec(w1p.shape), param_spec(b1p.shape),
                param_spec(w2p.shape), param_spec(b2p.shape),
                param_spec(w3p.shape), param_spec(b3p.shape),
            ],
            out_specs=pl.BlockSpec((block_b, dp_out), lambda i: (i, 0)),
        ),
        compiler_params=pltpu.CompilerParams(
            dimension_semantics=("parallel",),
            vmem_limit_bytes=vmem_limit),
    )(xp, w1p, b1p, w2p, b2p, w3p, b3p)

    # Strip the batch and output-column padding.
    return out_p[:B, :d_out]


def init_params(key, dim_entree, couche_cachee, dim_sortie):
    """Deterministic synthetic init (PyTorch-style uniform fan_in bound)."""
    sizes = [dim_entree] + list(couche_cachee) + [dim_sortie]
    names = ["1", "2", "3"]
    params = {}
    for n, (fan_in, fan_out) in zip(names, zip(sizes[:-1], sizes[1:])):
        key, kw, kb = jax.random.split(key, 3)
        bound = 1.0 / jnp.sqrt(fan_in)
        params["w" + n] = jax.random.uniform(
            kw, (fan_in, fan_out), jnp.float32, -bound, bound)
        params["b" + n] = jax.random.uniform(
            kb, (1, fan_out), jnp.float32, -bound, bound)
    return params


def politique_reference(x, p):
    h = jnp.maximum(x @ p["w1"] + p["b1"], 0.0)
    h = jnp.maximum(h @ p["w2"] + p["b2"], 0.0)
    logits = h @ p["w3"] + p["b3"]
    return jax.nn.softmax(logits, axis=1)


# TODO(synk): Politique.action() (Categorical sampling / log_prob) is a
# host-side RL utility, not part of the module's forward pass; not ported.

if __name__ == "__main__":
    # CartPole-ish sizes: state dim 4, 2 actions, hidden [64, 32].
    dim_entree, dim_sortie = 4, 2
    couche_cachee = [64, 32]

    key = jax.random.PRNGKey(0)
    key, kx1, kx2 = jax.random.split(key, 3)
    params = init_params(key, dim_entree, couche_cachee, dim_sortie)

    # Case 1: tiny CartPole-style batch (single tile).
    x_small = jax.random.normal(kx1, (8, dim_entree), jnp.float32)
    out_small = jax.block_until_ready(politique_forward(x_small, params))
    ref_small = politique_reference(x_small, params)

    # Case 2: batched rollout — exercises multi-tile grid (>= 2 steps).
    x_big = jax.random.normal(kx2, (512, dim_entree), jnp.float32)
    out_big = jax.block_until_ready(politique_forward(x_big, params))
    ref_big = politique_reference(x_big, params)

    for out, ref in ((out_small, ref_small), (out_big, ref_big)):
        assert out.shape == ref.shape
        # approx reciprocal (EUP) => slightly looser tolerance than exact divide
        assert jnp.allclose(out, ref, atol=2e-3, rtol=2e-3), \
            float(jnp.max(jnp.abs(out - ref)))
        assert jnp.allclose(jnp.sum(out, axis=1), 1.0, atol=2e-3)

    print("KERNEL_OK")
</pallas_src>

<mosaic_0001>
module attributes {stable_mosaic.version = 11 : i64} {
  func.func @_politique_kernel(%arg0: i32, %arg1: memref<8x128xf32, #tpu.memory_space<vmem>>, %arg2: memref<128x128xf32, #tpu.memory_space<vmem>>, %arg3: memref<1x128xf32, #tpu.memory_space<vmem>>, %arg4: memref<128x128xf32, #tpu.memory_space<vmem>>, %arg5: memref<1x128xf32, #tpu.memory_space<vmem>>, %arg6: memref<128x128xf32, #tpu.memory_space<vmem>>, %arg7: memref<1x128xf32, #tpu.memory_space<vmem>>, %arg8: memref<8x128xf32, #tpu.memory_space<vmem>>) attributes {dimension_semantics = [#tpu.dimension_semantics<parallel>], iteration_bounds = array<i64: 1>, scalar_prefetch = 0 : i64, scratch_operands = 0 : i64, tpu.core_type = #tpu.core_type<tc>, window_params = [{transform_indices = @transform_0, window_bounds = array<i64: 8, 128>}, {pipeline_mode = #tpu.pipeline_mode<synchronous>, transform_indices = @transform_1, window_bounds = array<i64: 128, 128>}, {pipeline_mode = #tpu.pipeline_mode<synchronous>, transform_indices = @transform_2, window_bounds = array<i64: 1, 128>}, {pipeline_mode = #tpu.pipeline_mode<synchronous>, transform_indices = @transform_3, window_bounds = array<i64: 128, 128>}, {pipeline_mode = #tpu.pipeline_mode<synchronous>, transform_indices = @transform_4, window_bounds = array<i64: 1, 128>}, {pipeline_mode = #tpu.pipeline_mode<synchronous>, transform_indices = @transform_5, window_bounds = array<i64: 128, 128>}, {pipeline_mode = #tpu.pipeline_mode<synchronous>, transform_indices = @transform_6, window_bounds = array<i64: 1, 128>}, {transform_indices = @transform_7, window_bounds = array<i64: 8, 128>}]} {
    %c0 = arith.constant 0 : index
    %c0_0 = arith.constant 0 : index
    %0 = vector.load %arg1[%c0, %c0_0] : memref<8x128xf32, #tpu.memory_space<vmem>>, vector<8x128xf32>
    %c0_1 = arith.constant 0 : index
    %c0_2 = arith.constant 0 : index
    %1 = vector.load %arg2[%c0_1, %c0_2] : memref<128x128xf32, #tpu.memory_space<vmem>>, vector<128x128xf32>
    %cst = arith.constant dense<0.000000e+00> : vector<8x128xf32>
    %2 = tpu.matmul %0, %1, %cst {dimension_numbers = #tpu.dot_dimension_numbers<[1], [0], [0], [1], [0, 0, 1, 1], [], []>} : vector<8x128xf32>, vector<128x128xf32>, vector<8x128xf32> -> vector<8x128xf32>
    %c0_3 = arith.constant 0 : index
    %c0_4 = arith.constant 0 : index
    %3 = vector.load %arg3[%c0_3, %c0_4] : memref<1x128xf32, #tpu.memory_space<vmem>>, vector<1x128xf32>
    %4 = vector.broadcast %3 : vector<1x128xf32> to vector<8x128xf32>
    %5 = arith.addf %2, %4 : vector<8x128xf32>
    %cst_5 = arith.constant 0.000000e+00 : f32
    %6 = vector.broadcast %cst_5 : f32 to vector<8x128xf32>
    %7 = arith.maximumf %5, %6 : vector<8x128xf32>
    %c0_6 = arith.constant 0 : index
    %c0_7 = arith.constant 0 : index
    %8 = vector.load %arg4[%c0_6, %c0_7] : memref<128x128xf32, #tpu.memory_space<vmem>>, vector<128x128xf32>
    %cst_8 = arith.constant dense<0.000000e+00> : vector<8x128xf32>
    %9 = tpu.matmul %7, %8, %cst_8 {dimension_numbers = #tpu.dot_dimension_numbers<[1], [0], [0], [1], [0, 0, 1, 1], [], []>} : vector<8x128xf32>, vector<128x128xf32>, vector<8x128xf32> -> vector<8x128xf32>
    %c0_9 = arith.constant 0 : index
    %c0_10 = arith.constant 0 : index
    %10 = vector.load %arg5[%c0_9, %c0_10] : memref<1x128xf32, #tpu.memory_space<vmem>>, vector<1x128xf32>
    %11 = vector.broadcast %10 : vector<1x128xf32> to vector<8x128xf32>
    %12 = arith.addf %9, %11 : vector<8x128xf32>
    %cst_11 = arith.constant 0.000000e+00 : f32
    %13 = vector.broadcast %cst_11 : f32 to vector<8x128xf32>
    %14 = arith.maximumf %12, %13 : vector<8x128xf32>
    %c0_12 = arith.constant 0 : index
    %c0_13 = arith.constant 0 : index
    %15 = vector.load %arg6[%c0_12, %c0_13] : memref<128x128xf32, #tpu.memory_space<vmem>>, vector<128x128xf32>
    %cst_14 = arith.constant dense<0.000000e+00> : vector<8x128xf32>
    %16 = tpu.matmul %14, %15, %cst_14 {dimension_numbers = #tpu.dot_dimension_numbers<[1], [0], [0], [1], [0, 0, 1, 1], [], []>} : vector<8x128xf32>, vector<128x128xf32>, vector<8x128xf32> -> vector<8x128xf32>
    %c0_15 = arith.constant 0 : index
    %c0_16 = arith.constant 0 : index
    %17 = vector.load %arg7[%c0_15, %c0_16] : memref<1x128xf32, #tpu.memory_space<vmem>>, vector<1x128xf32>
    %18 = vector.broadcast %17 : vector<1x128xf32> to vector<8x128xf32>
    %19 = arith.addf %16, %18 : vector<8x128xf32>
    %20 = tpu.iota {dimensions = array<i32: 1>} : vector<8x128xi32>
    %c2_i32 = arith.constant 2 : i32
    %21 = vector.broadcast %c2_i32 : i32 to vector<8x128xi32>
    %22 = arith.cmpi slt, %20, %21 : vector<8x128xi32>
    %cst_17 = arith.constant 0xFF800000 : f32
    %23 = vector.broadcast %cst_17 : f32 to vector<8x128xf32>
    %24 = arith.select %22, %19, %23 : vector<8x128xi1>, vector<8x128xf32>
    %cst_18 = arith.constant dense<0xFF800000> : vector<8xf32>
    %25 = vector.multi_reduction <maximumf>, %24, %cst_18 [1] : vector<8x128xf32> to vector<8xf32>
    %26 = vector.shape_cast %25 : vector<8xf32> to vector<8x1xf32>
    %27 = vector.broadcast %26 : vector<8x1xf32> to vector<8x128xf32>
    %28 = arith.subf %24, %27 : vector<8x128xf32>
    %29 = math.exp %28 : vector<8x128xf32>
    %cst_19 = arith.constant dense<0.000000e+00> : vector<8xf32>
    %30 = vector.multi_reduction <add>, %29, %cst_19 [1] : vector<8x128xf32> to vector<8xf32>
    %31 = vector.shape_cast %30 : vector<8xf32> to vector<8x1xf32>
    %32 = tpu.reciprocal %31 {approx = true} : vector<8x1xf32> -> vector<8x1xf32>
    %33 = vector.broadcast %32 : vector<8x1xf32> to vector<8x128xf32>
    %34 = arith.mulf %29, %33 : vector<8x128xf32>
    %c0_20 = arith.constant 0 : index
    %c0_21 = arith.constant 0 : index
    %35 = vector.load %arg8[%c0_20, %c0_21] : memref<8x128xf32, #tpu.memory_space<vmem>>, vector<8x128xf32>
    tpu.vector_store %arg8[%c0_20, %c0_21], %34 {strides = array<i32>} : memref<8x128xf32, #tpu.memory_space<vmem>>, vector<8x128xf32>,
    return
  }
  func.func @transform_0(%arg0: i32) -> (i32, i32) {
    %c0_i32 = arith.constant 0 : i32
    %c0_i32_0 = arith.constant 0 : i32
    return %arg0, %c0_i32 : i32, i32
  }
  func.func @transform_1(%arg0: i32) -> (i32, i32) {
    %c0_i32 = arith.constant 0 : i32
    %c0_i32_0 = arith.constant 0 : i32
    %c0_i32_1 = arith.constant 0 : i32
    return %c0_i32, %c0_i32_0 : i32, i32
  }
  func.func @transform_2(%arg0: i32) -> (i32, i32) {
    %c0_i32 = arith.constant 0 : i32
    %c0_i32_0 = arith.constant 0 : i32
    %c0_i32_1 = arith.constant 0 : i32
    return %c0_i32, %c0_i32_0 : i32, i32
  }
  func.func @transform_3(%arg0: i32) -> (i32, i32) {
    %c0_i32 = arith.constant 0 : i32
    %c0_i32_0 = arith.constant 0 : i32
    %c0_i32_1 = arith.constant 0 : i32
    return %c0_i32, %c0_i32_0 : i32, i32
  }
  func.func @transform_4(%arg0: i32) -> (i32, i32) {
    %c0_i32 = arith.constant 0 : i32
    %c0_i32_0 = arith.constant 0 : i32
    %c0_i32_1 = arith.constant 0 : i32
    return %c0_i32, %c0_i32_0 : i32, i32
  }
  func.func @transform_5(%arg0: i32) -> (i32, i32) {
    %c0_i32 = arith.constant 0 : i32
    %c0_i32_0 = arith.constant 0 : i32
    %c0_i32_1 = arith.constant 0 : i32
    return %c0_i32, %c0_i32_0 : i32, i32
  }
  func.func @transform_6(%arg0: i32) -> (i32, i32) {
    %c0_i32 = arith.constant 0 : i32
    %c0_i32_0 = arith.constant 0 : i32
    %c0_i32_1 = arith.constant 0 : i32
    return %c0_i32, %c0_i32_0 : i32, i32
  }
  func.func @transform_7(%arg0: i32) -> (i32, i32) {
    %c0_i32 = arith.constant 0 : i32
    %c0_i32_0 = arith.constant 0 : i32
    return %arg0, %c0_i32 : i32, i32
  }
}

</mosaic_0001>

<bundles_post_ra>
// kernel: tpu_custom_call.1
= control target key start
LH: loop header
LB: loop body
LE: loop exit
PB: predicated region body
PF: predicated region fallthrough
CT: control target
= control target key end

     0   :  { %12 = vsyncpa [#allocation3], 0  ;;  %s809_s0 = inlined_call_operand.hbm [shape: f32[8,128], index: 0, kind: input, shape index: {}]   ;;  %s810_s1 = inlined_call_operand.hbm [shape: f32[128,128], index: 1, kind: input, shape index: {}]   ;;  %s811_s2 = inlined_call_operand.vmem [shape: f32[1,128], index: 2, kind: input, shape index: {}]   ;;  %s812_s3 = inlined_call_operand.hbm [shape: f32[128,128], index: 3, kind: input, shape index: {}]   ;;  %s813_s4 = inlined_call_operand.vmem [shape: f32[1,128], index: 4, kind: input, shape index: {}]   ;;  %s814_s5 = inlined_call_operand.hbm [shape: f32[128,128], index: 5, kind: input, shape index: {}]   ;;  %s815_s6 = inlined_call_operand.vmem [shape: f32[1,128], index: 6, kind: input, shape index: {}]   ;;  %s816_s7 = inlined_call_operand.hbm [shape: f32[8,128], index: 7, kind: output, shape index: {}]  }
   0x1   :  { %13 = vsyncpa [#allocation6], 0 }
   0x2   :  { %14 = vsyncpa [#allocation9], 0 }
   0x3   :  { %15 = vsyncpa [#allocation4], 0  ;;  %s673_s24 = smov [#allocation5]  }
   0x4   :  { %s31_s25 = sshll.u32 %s673_s24, 4  ;;  %s32_s25 = int_to_ptr.vmem [resolvable:$true] %s31_s25 }
   0x5   :  { %s573_s26 = scalar_lea.vmem %s32_s25, 2048  ;;  %p578_p1 = scmp.lt.s32.totalorder %s32_s25, %s32_s25 }
   0x6   :  { %p574_p0 = scmp.ne.s32.totalorder %s32_s25, %s573_s26  ;;  %p579_p2 = scmp.lt.s32.totalorder %s573_s26, %s573_s26 }
   0x8   :  { %p580_p3 = por %p579_p2, %p578_p1 }
   0xa   :  { %p581_p4 = pnand %p580_p3, %p574_p0 }
   0xc   :  { %584 = shalt.err (!%p581_p4)
}
   0xd   :  { %s674_s27 = smov 128   ;;  %s675_s28 = smov 8  }
   0xe   :  { %37 = dma.hbm_to_vmem [thread:$0]  %s810_s1, 2048, %s32_s25, [#allocation6], %s674_s27, %s674_s27, %s675_s28  }
   0xf   :  { %s676_s8 = smov [#allocation2]   ;;  %s677_s10 = smov [#allocation7]  }
  0x10   :  { %s22_s9 = sshll.u32 %s676_s8, 4  ;;  %s45_s11 = sshll.u32 %s677_s10, 4  ;;  %s23_s9 = int_to_ptr.vmem [resolvable:$true] %s22_s9  ;;  %s46_s11 = int_to_ptr.vmem [resolvable:$true] %s45_s11 }
  0x11   :  { %s593_s12 = scalar_lea.vmem %s23_s9, 128  ;;  %p598_p6 = scmp.lt.s32.totalorder %s23_s9, %s23_s9 }
  0x12   :  { %p594_p5 = scmp.ne.s32.totalorder %s23_s9, %s593_s12  ;;  %p599_p7 = scmp.lt.s32.totalorder %s593_s12, %s593_s12 }
  0x14   :  { %p600_p8 = por %p599_p7, %p598_p6 }
  0x16   :  { %p601_p9 = pnand %p600_p8, %p594_p5 }
  0x18   :  { %604 = shalt.err (!%p601_p9)
}
  0x19   :  { %25 = dma.hbm_to_vmem [thread:$0]  %s809_s0, 128, %s23_s9, [#allocation3]  }
  0x1a   :  { %s613_s15 = scalar_lea.vmem %s46_s11, 2048  ;;  %p618_p11 = scmp.lt.s32.totalorder %s46_s11, %s46_s11 }
  0x1b   :  { %p614_p10 = scmp.ne.s32.totalorder %s46_s11, %s613_s15  ;;  %p619_p12 = scmp.lt.s32.totalorder %s613_s15, %s613_s15 }
  0x1d   :  { %p620_p13 = por %p619_p12, %p618_p11 }
  0x1f   :  { %p621_p0 = pnand %p620_p13, %p614_p10 }
  0x21   :  { %624 = shalt.err (!%p621_p0)
}
  0x22   :  { %51 = dma.hbm_to_vmem [thread:$0]  %s812_s3, 2048, %s46_s11, [#allocation6], %s674_s27, %s674_s27, %s675_s28  }
  0x23   :  { %s678_s17 = smov [#allocation8]  }
  0x24   :  { %s59_s18 = sshll.u32 %s678_s17, 4  ;;  %s60_s18 = int_to_ptr.vmem [resolvable:$true] %s59_s18 }
  0x25   :  { %s633_s19 = scalar_lea.vmem %s60_s18, 2048  ;;  %p638_p2 = scmp.lt.s32.totalorder %s60_s18, %s60_s18 }
  0x26   :  { %p634_p1 = scmp.ne.s32.totalorder %s60_s18, %s633_s19  ;;  %p639_p3 = scmp.lt.s32.totalorder %s633_s19, %s633_s19 }
  0x28   :  { %p640_p4 = por %p639_p3, %p638_p2 }
  0x2a   :  { %p641_p5 = pnand %p640_p4, %p634_p1 }
  0x2c   :  { %644 = shalt.err (!%p641_p5)
}
  0x2d   :  { %65 = dma.hbm_to_vmem [thread:$0]  %s814_s5, 2048, %s60_s18, [#allocation9], %s674_s27, %s674_s27, %s675_s28  }
  0x2e   :  { %665 = dma.done.wait [#allocation3], 128  }
  0x2f   :  { %666 = vsyncadd [#allocation3], 4294967168 }
  0x30   :  { %667 = dma.done.wait [#allocation6], 4096  }
  0x31   :  { %668 = vsyncadd [#allocation6], 4294963200 }
  0x32   :  { %669 = dma.done.wait [#allocation9], 2048  }
  0x33   :  { %670 = vsyncadd [#allocation9], 4294965248  ;;  %v679_v0 = vmov 0.0   ;;  %vm680_vm0 = vmmov 0   ;;  %v96_v1 = vld [vmem:[#allocation5 + $0x78] sm:$0xff]  ;;  %v95_v2 = vld [vmem:[#allocation5 + $0x70] sm:$0xff]  ;;  %v362_v60 = vlaneseq }
  0x34   :  { %447 = vmatprep.subr.mxu0 %v679_v0  ;;  %479 = vmatprep.mubr.msk.f32.mxu0 %vm680_vm0, %v679_v0  ;;  %v94_v3 = vld [vmem:[#allocation5 + $0x68] sm:$0xff]  ;;  %v93_v4 = vld [vmem:[#allocation5 + $0x60] sm:$0xff]  ;;  %v190_v5 = vld [vmem:[#allocation7 + $0x78] sm:$0xff] }
  0x35   :  { %482 = vmatprep.subr.mxu1 %v679_v0  ;;  %514 = vmatprep.mubr.msk.f32.mxu1 %vm680_vm0, %v679_v0  ;;  %v92_v6 = vld [vmem:[#allocation5 + $0x58] sm:$0xff]  ;;  %v189_v7 = vld [vmem:[#allocation7 + $0x70] sm:$0xff]  ;;  %v188_v8 = vld [vmem:[#allocation7 + $0x68] sm:$0xff]  ;;  %v363_v61 = vand.u32 127, %v362_v60 }
  0x36   :  { %448 = vmatpush3.msra.mxu0 %v96_v1  ;;  %483 = vmatpush3.msra.mxu1 %v190_v5  ;;  %v91_v9 = vld [vmem:[#allocation5 + $0x50] sm:$0xff]  ;;  %v187_v10 = vld [vmem:[#allocation7 + $0x60] sm:$0xff]  ;;  %v90_v11 = vld [vmem:[#allocation5 + $0x48] sm:$0xff] }
  0x37   :  { %449 = vmatprep.subr.mxu0 %v679_v0  ;;  %484 = vmatprep.subr.mxu1 %v679_v0  ;;  %v186_v12 = vld [vmem:[#allocation7 + $0x58] sm:$0xff]  ;;  %v89_v13 = vld [vmem:[#allocation5 + $0x40] sm:$0xff]  ;;  %v185_v14 = vld [vmem:[#allocation7 + $0x50] sm:$0xff]  ;;  %vm364_vm1 = vcmp.lt.s32.totalorder %v363_v61, 2 }
  0x38   :  { %450 = vmatpush3.msra.mxu0 %v95_v2  ;;  %485 = vmatpush3.msra.mxu1 %v189_v7  ;;  %v88_v15 = vld [vmem:[#allocation5 + $0x38] sm:$0xff]  ;;  %v184_v16 = vld [vmem:[#allocation7 + $0x48] sm:$0xff]  ;;  %v87_v17 = vld [vmem:[#allocation5 + $0x30] sm:$0xff] }
  0x39   :  { %451 = vmatprep.subr.mxu0 %v679_v0  ;;  %486 = vmatprep.subr.mxu1 %v679_v0  ;;  %v183_v18 = vld [vmem:[#allocation7 + $0x40] sm:$0xff]  ;;  %v86_v19 = vld [vmem:[#allocation5 + $0x28] sm:$0xff]  ;;  %v182_v20 = vld [vmem:[#allocation7 + $0x38] sm:$0xff] }
  0x3a   :  { %452 = vmatpush3.msra.mxu0 %v94_v3  ;;  %487 = vmatpush3.msra.mxu1 %v188_v8  ;;  %v85_v21 = vld [vmem:[#allocation5 + $0x20] sm:$0xff]  ;;  %v181_v22 = vld [vmem:[#allocation7 + $0x30] sm:$0xff]  ;;  %v84_v23 = vld [vmem:[#allocation5 + $0x18] sm:$0xff] }
  0x3b   :  { %453 = vmatprep.subr.mxu0 %v679_v0  ;;  %488 = vmatprep.subr.mxu1 %v679_v0  ;;  %v180_v24 = vld [vmem:[#allocation7 + $0x28] sm:$0xff]  ;;  %v83_v25 = vld [vmem:[#allocation5 + $0x10] sm:$0xff]  ;;  %v179_v26 = vld [vmem:[#allocation7 + $0x20] sm:$0xff] }
  0x3c   :  { %454 = vmatpush3.msra.mxu0 %v93_v4  ;;  %489 = vmatpush3.msra.mxu1 %v187_v10  ;;  %v82_v27 = vld [vmem:[#allocation5 + $0x8] sm:$0xff]  ;;  %v178_v28 = vld [vmem:[#allocation7 + $0x18] sm:$0xff]  ;;  %v81_v29 = vld [vmem:[#allocation5] sm:$0xff] }
  0x3d   :  { %455 = vmatprep.subr.mxu0 %v679_v0  ;;  %490 = vmatprep.subr.mxu1 %v679_v0  ;;  %v80_v30 = vld [vmem:[#allocation2] sm:$0xff]  ;;  %v177_v31 = vld [vmem:[#allocation7 + $0x10] sm:$0xff]  ;;  %v176_v32 = vld [vmem:[#allocation7 + $0x8] sm:$0xff] }
  0x3e   :  { %456 = vmatpush3.msra.mxu0 %v92_v6  ;;  %491 = vmatpush3.msra.mxu1 %v186_v12  ;;  %v175_v33 = vld [vmem:[#allocation7] sm:$0xff]  ;;  %v284_v34 = vld [vmem:[#allocation8 + $0x78] sm:$0xff]  ;;  %v283_v35 = vld [vmem:[#allocation8 + $0x70] sm:$0xff] }
  0x3f   :  { %457 = vmatprep.subr.mxu0 %v679_v0  ;;  %492 = vmatprep.subr.mxu1 %v679_v0  ;;  %v282_v36 = vld [vmem:[#allocation8 + $0x68] sm:$0xff]  ;;  %v281_v37 = vld [vmem:[#allocation8 + $0x60] sm:$0xff]  ;;  %v280_v38 = vld [vmem:[#allocation8 + $0x58] sm:$0xff] }
  0x40   :  { %458 = vmatpush3.msra.mxu0 %v91_v9  ;;  %493 = vmatpush3.msra.mxu1 %v185_v14  ;;  %v279_v39 = vld [vmem:[#allocation8 + $0x50] sm:$0xff]  ;;  %v278_v40 = vld [vmem:[#allocation8 + $0x48] sm:$0xff]  ;;  %v277_v41 = vld [vmem:[#allocation8 + $0x40] sm:$0xff] }
  0x41   :  { %459 = vmatprep.subr.mxu0 %v679_v0  ;;  %494 = vmatprep.subr.mxu1 %v679_v0  ;;  %v276_v42 = vld [vmem:[#allocation8 + $0x38] sm:$0xff]  ;;  %v275_v43 = vld [vmem:[#allocation8 + $0x30] sm:$0xff]  ;;  %v274_v44 = vld [vmem:[#allocation8 + $0x28] sm:$0xff] }
  0x42   :  { %460 = vmatpush3.msra.mxu0 %v90_v11  ;;  %495 = vmatpush3.msra.mxu1 %v184_v16  ;;  %v273_v45 = vld [vmem:[#allocation8 + $0x20] sm:$0xff]  ;;  %v272_v46 = vld [vmem:[#allocation8 + $0x18] sm:$0xff]  ;;  %v271_v52 = vld [vmem:[#allocation8 + $0x10] sm:$0xff] }
  0x43   :  { %461 = vmatprep.subr.mxu0 %v679_v0  ;;  %496 = vmatprep.subr.mxu1 %v679_v0  ;;  %v393_v47 = vld [vmem:[%s811_s2] ss:$0 sm:$0xff]  ;;  %v270_v53 = vld [vmem:[#allocation8 + $0x8] sm:$0xff]  ;;  %v269_v54 = vld [vmem:[#allocation8] sm:$0xff] }
  0x44   :  { %462 = vmatpush3.msra.mxu0 %v89_v13  ;;  %497 = vmatpush3.msra.mxu1 %v183_v18  ;;  %v394_v55 = vld [vmem:[%s813_s4] ss:$0 sm:$0xff]  ;;  %s681_s4 = smov [#allocation10]  }
  0x45   :  { %463 = vmatprep.subr.mxu0 %v679_v0  ;;  %498 = vmatprep.subr.mxu1 %v679_v0  ;;  %v395_v62 = vld [vmem:[%s815_s6] ss:$0 sm:$0xff]  ;;  %s382_s24 = sshll.u32 %s681_s4, 4  ;;  %s383_s24 = int_to_ptr.vmem [resolvable:$true] %s382_s24 }
  0x46   :  { %464 = vmatpush3.msra.mxu0 %v88_v15  ;;  %499 = vmatpush3.msra.mxu1 %v182_v20  ;;  %s645_s6 = scalar_lea.vmem %s383_s24, 128  ;;  %p650_p7 = scmp.lt.s32.totalorder %s383_s24, %s383_s24 }
  0x47   :  { %465 = vmatprep.subr.mxu0 %v679_v0  ;;  %500 = vmatprep.subr.mxu1 %v679_v0  ;;  %p646_p6 = scmp.ne.s32.totalorder %s383_s24, %s645_s6  ;;  %p651_p8 = scmp.lt.s32.totalorder %s645_s6, %s645_s6 }
  0x48   :  { %466 = vmatpush3.msra.mxu0 %v87_v17  ;;  %501 = vmatpush3.msra.mxu1 %v181_v22 }
  0x49   :  { %467 = vmatprep.subr.mxu0 %v679_v0  ;;  %502 = vmatprep.subr.mxu1 %v679_v0  ;;  %p652_p9 = por %p651_p8, %p650_p7 }
  0x4a   :  { %468 = vmatpush3.msra.mxu0 %v86_v19  ;;  %503 = vmatpush3.msra.mxu1 %v180_v24 }
  0x4b   :  { %469 = vmatprep.subr.mxu0 %v679_v0  ;;  %504 = vmatprep.subr.mxu1 %v679_v0  ;;  %p653_p10 = pnand %p652_p9, %p646_p6 }
  0x4c   :  { %470 = vmatpush3.msra.mxu0 %v85_v21  ;;  %505 = vmatpush3.msra.mxu1 %v179_v26 }
  0x4d   :  { %471 = vmatprep.subr.mxu0 %v679_v0  ;;  %506 = vmatprep.subr.mxu1 %v679_v0 }
  0x4e   :  { %472 = vmatpush3.msra.mxu0 %v84_v23  ;;  %507 = vmatpush3.msra.mxu1 %v178_v28 }
  0x4f   :  { %473 = vmatprep.subr.mxu0 %v679_v0  ;;  %508 = vmatprep.subr.mxu1 %v679_v0 }
  0x50   :  { %474 = vmatpush3.msra.mxu0 %v83_v25  ;;  %509 = vmatpush3.msra.mxu1 %v177_v31 }
  0x51   :  { %475 = vmatprep.subr.mxu0 %v679_v0  ;;  %510 = vmatprep.subr.mxu1 %v679_v0 }
  0x52   :  { %476 = vmatpush3.msra.mxu0 %v82_v27  ;;  %511 = vmatpush3.msra.mxu1 %v176_v32 }
  0x53   :  { %477 = vmatprep.subr.mxu0 %v679_v0  ;;  %512 = vmatprep.subr.mxu1 %v679_v0 }
  0x54   :  { %478 = vmatpush3.msra.mxu0 %v81_v29  ;;  %513 = vmatpush3.msra.mxu1 %v175_v33 }
  0x55   :  { %480 = vmatmul.mubr.f32.vlgmr.msra.gmra.mxu0 %v80_v30  ;;  %517 = vmatprep.subr.mxu0 %v679_v0 }
  0x56   :  { %549 = vmatprep.mubr.msk.f32.mxu0 %vm680_vm0, %v679_v0  ;;  %518 = vmatpush3.msra.mxu0 %v284_v34 }
  0x57   :  { %519 = vmatprep.subr.mxu0 %v679_v0 }
  0x58   :  { %520 = vmatpush3.msra.mxu0 %v283_v35 }
  0x59   :  { %521 = vmatprep.subr.mxu0 %v679_v0 }
  0x5a   :  { %522 = vmatpush3.msra.mxu0 %v282_v36 }
  0x5b   :  { %523 = vmatprep.subr.mxu0 %v679_v0 }
  0x5c   :  { %524 = vmatpush3.msra.mxu0 %v281_v37 }
  0x5d   :  { %525 = vmatprep.subr.mxu0 %v679_v0 }
  0x5e   :  { %526 = vmatpush3.msra.mxu0 %v280_v38 }
  0x5f   :  { %527 = vmatprep.subr.mxu0 %v679_v0 }
  0x60   :  { %528 = vmatpush3.msra.mxu0 %v279_v39 }
  0x61   :  { %529 = vmatprep.subr.mxu0 %v679_v0 }
  0x62   :  { %530 = vmatpush3.msra.mxu0 %v278_v40 }
  0x63   :  { %531 = vmatprep.subr.mxu0 %v679_v0 }
  0x64   :  { %532 = vmatpush3.msra.mxu0 %v277_v41 }
  0x65   :  { %533 = vmatprep.subr.mxu0 %v679_v0 }
  0x66   :  { %534 = vmatpush3.msra.mxu0 %v276_v42 }
  0x67   :  { %535 = vmatprep.subr.mxu0 %v679_v0 }
  0x68   :  { %536 = vmatpush3.msra.mxu0 %v275_v43 }
  0x69   :  { %537 = vmatprep.subr.mxu0 %v679_v0 }
  0x6a   :  { %538 = vmatpush3.msra.mxu0 %v274_v44 }
  0x6b   :  { %539 = vmatprep.subr.mxu0 %v679_v0 }
  0x6c   :  { %540 = vmatpush3.msra.mxu0 %v273_v45 }
  0x6d   :  { %541 = vmatprep.subr.mxu0 %v679_v0 }
  0x6e   :  { %542 = vmatpush3.msra.mxu0 %v272_v46 }
  0x6f   :  { %543 = vmatprep.subr.mxu0 %v679_v0 }
  0x70   :  { %544 = vmatpush3.msra.mxu0 %v271_v52 }
  0x71   :  { %545 = vmatprep.subr.mxu0 %v679_v0 }
  0x72   :  { %546 = vmatpush3.msra.mxu0 %v270_v53 }
  0x73   :  { %547 = vmatprep.subr.mxu0 %v679_v0 }
  0x74   :  { %548 = vmatpush3.msra.mxu0 %v269_v54 }
 0x115   :  { %v170_v48 = vpop.f32.mrf.mxu0 }
 0x116   :  { %v171_v49 = vadd.f32 %v393_v47, %v170_v48 }
 0x117   :  { %v481_v50 = vpop.f32.mrf.mxu0 }
 0x118   :  { %v174_v51 = vmax.f32 %v171_v49, 0.0 }
 0x11a   :  { %515 = vmatmul.mubr.f32.vlgmr.msra.gmra.mxu1 %v174_v51 }
 0x1da   :  { %v264_v56 = vpop.f32.mrf.mxu1 }
 0x1db   :  { %v265_v57 = vadd.f32 %v394_v55, %v264_v56 }
 0x1dc   :  { %v516_v58 = vpop.f32.mrf.mxu1 }
 0x1dd   :  { %v268_v59 = vmax.f32 %v265_v57, 0.0 }
 0x1df   :  { %550 = vmatmul.mubr.f32.vlgmr.msra.gmra.mxu0 %v268_v59 }
 0x29f   :  { %v358_v63 = vpop.f32.mrf.mxu0 }
 0x2a0   :  { %v359_v0 = vadd.f32 %v395_v62, %v358_v63 }
 0x2a1   :  { %v551_v1 = vpop.f32.mrf.mxu0 }
 0x2a2   :  { %v365_v2 = vsel %vm364_vm1, %v359_v0, -inf }
 0x2a3   :  { %366 = vmax.xlane.f32.xlu0 %v365_v2 }
 0x32c   :  { %v367_v3 = vpop.xlane.xlu0 %366 }
 0x32d   :  { %v368_v4 = vsub.f32 %v365_v2, %v367_v3 }
 0x32f   :  { %v369_v5 = vmul.f32 1.442695, %v368_v4 }
 0x331   :  { %561 = vpow2.f32 %v369_v5 }
 0x33e   :  { %v562_v6 = vpop.eup %561 }
 0x33f   :  { %371 = vadd.xlane.f32.xlu0 %v562_v6 }
 0x3c8   :  { %v372_v7 = vpop.xlane.xlu0 %371 }
 0x3c9   :  { %563 = vrcp.f32 %v372_v7 }
 0x3d6   :  { %v564_v8 = vpop.eup %563 }
 0x3d7   :  { %v374_v9 = vmul.f32 %v564_v8, %v562_v6 }
 0x3d9   :  { %375 = vst [vmem:[#allocation10] sm:$0xff] %v374_v9 }
 0x3da   :  { %656 = shalt.err (!%p653_p10)
}
 0x3db   :  { %385 = dma.vmem_to_hbm [thread:$0]  %s383_s24, 128, %s816_s7, [#allocation4]  }
 0x3dc   :  { %671 = dma.done.wait [#allocation4], 128  }
 0x3dd   :  { %672 = vsyncadd [#allocation4], 4294967168 }
 0x3de   :  { %389 = vsyncpa [#allocation3], 1 }
 0x3df   :  { %390 = vsyncpa [#allocation6], 1 }
 0x3e0   :  { %391 = vsyncpa [#allocation9], 1 }
 0x3e1   :  { %392 = vsyncpa [#allocation4], 1 }

</bundles_post_ra>
